<compile_context>
chip_gen: v7x
topology: tpu7x:2x2x1
jax: 0.10.0
libtpu: 0.0.40
codegen_flags: <defaults>
</compile_context>

<pallas_src>
import functools

import jax
import jax.numpy as jnp
from jax.experimental import pallas as pl
from jax.experimental.pallas import tpu as pltpu

EPS = 1e-5  # matches torch LayerNorm default eps


def _round_up(a, m):
    return (a + m - 1) // m * m


def _pick_tile_b(n, row_align, max_tile_b):
    """Batch tile: one step for tiny n, >=2 'parallel' steps otherwise (megacore)."""
    n_al = _round_up(n, row_align)
    if n_al <= 2 * row_align:          # tiny batch: single grid step
        return n_al
    if n_al <= max_tile_b:             # moderate: 2 steps -> both v7x TensorCores
        return _round_up(n_al // 2, row_align)
    return max_tile_b                  # large: big tiles amortize per-step overhead


# ----------------------------------------------------------------------------- kernel
def _mlp_kernel(depth, width, compute_dtype,
                x_ref, w0_ref, wh_ref, wo_ref, bh_ref, bo_ref, o_ref):
    """Whole MLP forward for one (tile_b, d_in) row tile.

    x_ref  : (tile_b, d_in)          activations (storage dtype; cast in-kernel)
    w0_ref : (d_in, W_p)             first weight (compute_dtype)
    wh_ref : (depth-1, W_p, W_p)     hidden weights, prev-norm gamma folded in
    wo_ref : (W_p, D_out_p)          output weight, last-norm gamma folded in
    bh_ref : (depth, W_p) f32        [b0, bfold_1, ..., bfold_{depth-1}]
    bo_ref : (1, D_out_p) f32        folded output bias
    o_ref  : (tile_b, D_out_p) f32
    """
    inv_w = 1.0 / float(width)

    def normalize(h):
        # pure (non-affine) layernorm: (h - mu) * rsqrt(var + eps)  ==  h * a + t
        # padded lanes of h are exactly zero, so sums over the full lane width
        # divided by `width` give the correct statistics.
        mu = jnp.sum(h, axis=-1, keepdims=True) * inv_w
        ms = jnp.sum(h * h, axis=-1, keepdims=True) * inv_w
        a = jax.lax.rsqrt(jnp.maximum(ms - mu * mu, 0.0) + EPS)
        t = -mu * a
        return h * a + t

    # ---- first block: Linear -> ReLU  (bias un-folded; padded lanes stay 0) ----
    h = jnp.dot(x_ref[...].astype(compute_dtype), w0_ref[...],
                preferred_element_type=jnp.float32)
    h = jnp.maximum(h + bh_ref[0:1, :], 0.0)

    # ---- hidden blocks: previous norm's affine already folded into wh / bias ----
    for l in range(depth - 1):
        n = normalize(h).astype(compute_dtype)
        h = jnp.dot(n, wh_ref[l], preferred_element_type=jnp.float32)
        h = jnp.maximum(h + bh_ref[l + 1:l + 2, :], 0.0)

    # ---- output projection (last norm's affine folded into wo / bo) ------------
    n = normalize(h).astype(compute_dtype)
    o_ref[...] = (jnp.dot(n, wo_ref[...], preferred_element_type=jnp.float32)
                  + bo_ref[...]).astype(o_ref.dtype)


# ----------------------------------------------------------------------------- packing
def pack_params(params, depth, width, input_size, output_size,
                compute_dtype=jnp.float32):
    """One-time packing: pad to 128 lanes, fold each norm's gamma/beta into the
    NEXT linear, stack the constants into 5 VMEM-resident arrays."""
    assert depth >= 2
    w_p = _round_up(width, 128)
    d_out_p = _round_up(output_size, 128)

    idx = 0

    def take():
        nonlocal idx
        v = params[idx]
        idx += 1
        return v

    def padc(a, cols):                       # zero-pad columns (last dim)
        return jnp.pad(a, ((0, 0), (0, cols - a.shape[1])))

    def padrc(a, rows, cols):                # zero-pad rows and columns
        return jnp.pad(a, ((0, rows - a.shape[0]), (0, cols - a.shape[1])))

    w0, b0, g_prev, be_prev = take(), take(), take(), take()
    bias_rows = [padc(b0, w_p)]
    wh_list = []
    for _ in range(depth - 1):
        w, b, g, be = take(), take(), take(), take()
        w_fold = g_prev.reshape(-1, 1) * w          # diag(g_prev) @ W
        b_fold = be_prev @ w + b                    # be_prev @ W + b
        wh_list.append(padrc(w_fold, w_p, w_p))
        bias_rows.append(padc(b_fold, w_p))
        g_prev, be_prev = g, be
    w_out, b_out = take(), take()
    wo_fold = g_prev.reshape(-1, 1) * w_out
    bo_fold = be_prev @ w_out + b_out

    return dict(
        w0=padc(w0, w_p).astype(compute_dtype),                 # (d_in, W_p)
        wh=jnp.stack(wh_list, axis=0).astype(compute_dtype),    # (depth-1, W_p, W_p)
        wo=padrc(wo_fold, w_p, d_out_p).astype(compute_dtype),  # (W_p, D_out_p)
        bh=jnp.concatenate(bias_rows, 0).astype(jnp.float32),   # (depth, W_p)
        bo=padc(bo_fold, d_out_p).astype(jnp.float32),          # (1, D_out_p)
    )


# ----------------------------------------------------------------------------- forward
def cen_drop_scaling_prenorm_mlp(x_flat, packed, depth, width, output_size,
                                 *, max_tile_b=1024):
    """x_flat: (N, d_in) f32 (already flattened, ext.View).  packed: pack_params()."""
    n, d_in = x_flat.shape
    compute_dtype = packed["w0"].dtype
    d_out_p = packed["wo"].shape[-1]

    row_align = 8 if packed["w0"].dtype.itemsize >= 4 else 16
    tile_b = _pick_tile_b(n, row_align, max_tile_b)
    grid = (pl.cdiv(n, tile_b),)

    kernel = functools.partial(_mlp_kernel, depth, width, compute_dtype)

    # Constant parameters: whole-array, non-pipelined VMEM residents.
    vmem = pl.BlockSpec(memory_space=pltpu.MemorySpace.VMEM)

    out = pl.pallas_call(
        kernel,
        out_shape=jax.ShapeDtypeStruct((n, d_out_p), jnp.float32),
        grid_spec=pltpu.PrefetchScalarGridSpec(
            num_scalar_prefetch=0,
            grid=grid,
            # x block: full-extent last dim (== d_in), so no 128-lane pad needed.
            in_specs=[pl.BlockSpec((tile_b, d_in), lambda i: (i, 0)),
                      vmem, vmem, vmem, vmem, vmem],
            out_specs=pl.BlockSpec((tile_b, d_out_p), lambda i: (i, 0)),
        ),
        compiler_params=pltpu.CompilerParams(
            dimension_semantics=("parallel",),
        ),
    )(x_flat, packed["w0"], packed["wh"], packed["wo"], packed["bh"], packed["bo"])

    return out[:, :output_size]


# ----------------------------------------------------------------------------- init / reference
def init_params(key, depth, width, input_size, output_size):
    """Deterministic init mimicking nn.Linear; gamma/beta randomized (instead of
    the trivial ones/zeros default) so the gamma/beta fold is actually exercised."""
    params = []
    keys = iter(jax.random.split(key, 6 * depth + 8))

    def linear(d_in, d_out):
        lim = 1.0 / (d_in ** 0.5)
        w = jax.random.uniform(next(keys), (d_in, d_out), jnp.float32, -lim, lim)
        b = jax.random.uniform(next(keys), (1, d_out), jnp.float32, -lim, lim)
        return w, b

    def affine(w_):
        g = 1.0 + 0.1 * jax.random.normal(next(keys), (1, w_), jnp.float32)
        be = 0.1 * jax.random.normal(next(keys), (1, w_), jnp.float32)
        return g, be

    w0, b0 = linear(input_size, width)
    g0, be0 = affine(width)
    params += [w0, b0, g0, be0]
    for _ in range(depth - 1):
        w, b = linear(width, width)
        g, be = affine(width)
        params += [w, b, g, be]
    w_out, b_out = linear(width, output_size)
    params += [w_out, b_out]
    return params


def reference_forward(x_flat, params, depth):
    """Pure-JAX reference (two-pass norms, un-folded affines, PyTorch semantics)."""
    idx = 0

    def take():
        nonlocal idx
        v = params[idx]
        idx += 1
        return v

    w0, b0, g0, be0 = take(), take(), take(), take()
    h = jnp.maximum(x_flat @ w0 + b0, 0.0)
    mu = jnp.mean(h, -1, keepdims=True)
    var = jnp.mean((h - mu) ** 2, -1, keepdims=True)
    h = (h - mu) * jax.lax.rsqrt(var + EPS) * g0 + be0
    for _ in range(depth - 1):
        w, b, g, be = take(), take(), take(), take()
        h = jnp.maximum(h @ w + b, 0.0)
        h = h - jnp.mean(h, -1, keepdims=True)                         # LayerNormCentering
        h = h * jax.lax.rsqrt(jnp.mean(h * h, -1, keepdims=True) + EPS) * g + be  # LayerNormScaling
    w_out, b_out = take(), take()
    return h @ w_out + b_out


if __name__ == "__main__":
    # x: (N, C, H, W) = (16, 1, 8, 8) -> input_size = 64 (ext.View flattens)
    depth, width, input_size, output_size = 4, 32, 64, 10

    key = jax.random.PRNGKey(0)
    k_x, k_p = jax.random.split(key)

    x = jax.random.normal(k_x, (16, 1, 8, 8), jnp.float32)
    x_flat = x.reshape(x.shape[0], -1)                 # ext.View(input_size)

    params = init_params(k_p, depth, width, input_size, output_size)
    ref = jax.block_until_ready(reference_forward(x_flat, params, depth))

    # ---- f32 path ------------------------------------------------------------
    packed_f32 = pack_params(params, depth, width, input_size, output_size,
                             compute_dtype=jnp.float32)
    out = cen_drop_scaling_prenorm_mlp(x_flat, packed_f32, depth, width, output_size)
    out = jax.block_until_ready(out)
    assert out.shape == (16, output_size)
    # Tolerance is moderate because the MXU f32-matmul precision policy may
    # differ between the XLA-compiled reference and the Mosaic kernel.
    assert jnp.allclose(out, ref, atol=5e-2, rtol=5e-2), \
        float(jnp.max(jnp.abs(out - ref)))

    # ---- bf16 matmul-operand path (f32 accumulation, f32 norm math) ----------
    packed_bf16 = pack_params(params, depth, width, input_size, output_size,
                              compute_dtype=jnp.bfloat16)
    out_bf = cen_drop_scaling_prenorm_mlp(x_flat, packed_bf16, depth, width,
                                          output_size)
    out_bf = jax.block_until_ready(out_bf)
    assert out_bf.shape == (16, output_size)
    assert bool(jnp.all(jnp.isfinite(out_bf)))
    assert jnp.allclose(out_bf, ref, atol=0.3, rtol=0.3)

    print("KERNEL_OK")
</pallas_src>

<mosaic_0001>
module attributes {stable_mosaic.version = 11 : i64} {
  func.func @_mlp_kernel(%arg0: i32, %arg1: memref<16x64xf32, #tpu.memory_space<vmem>>, %arg2: memref<64x128xf32, #tpu.memory_space<vmem>>, %arg3: memref<3x128x128xf32, #tpu.memory_space<vmem>>, %arg4: memref<128x128xf32, #tpu.memory_space<vmem>>, %arg5: memref<4x128xf32, #tpu.memory_space<vmem>>, %arg6: memref<1x128xf32, #tpu.memory_space<vmem>>, %arg7: memref<16x128xf32, #tpu.memory_space<vmem>>) attributes {dimension_semantics = [#tpu.dimension_semantics<parallel>], iteration_bounds = array<i64: 1>, scalar_prefetch = 0 : i64, scratch_operands = 0 : i64, tpu.core_type = #tpu.core_type<tc>, window_params = [{transform_indices = @transform_0, window_bounds = array<i64: 16, 64>}, {pipeline_mode = #tpu.pipeline_mode<synchronous>, transform_indices = @transform_1, window_bounds = array<i64: 64, 128>}, {pipeline_mode = #tpu.pipeline_mode<synchronous>, transform_indices = @transform_2, window_bounds = array<i64: 3, 128, 128>}, {pipeline_mode = #tpu.pipeline_mode<synchronous>, transform_indices = @transform_3, window_bounds = array<i64: 128, 128>}, {pipeline_mode = #tpu.pipeline_mode<synchronous>, transform_indices = @transform_4, window_bounds = array<i64: 4, 128>}, {pipeline_mode = #tpu.pipeline_mode<synchronous>, transform_indices = @transform_5, window_bounds = array<i64: 1, 128>}, {transform_indices = @transform_6, window_bounds = array<i64: 16, 128>}]} {
    %c0 = arith.constant 0 : index
    %c0_0 = arith.constant 0 : index
    %0 = vector.load %arg1[%c0, %c0_0] : memref<16x64xf32, #tpu.memory_space<vmem>>, vector<16x64xf32>
    %c0_1 = arith.constant 0 : index
    %c0_2 = arith.constant 0 : index
    %1 = vector.load %arg2[%c0_1, %c0_2] : memref<64x128xf32, #tpu.memory_space<vmem>>, vector<64x128xf32>
    %cst = arith.constant dense<0.000000e+00> : vector<16x128xf32>
    %2 = tpu.matmul %0, %1, %cst {dimension_numbers = #tpu.dot_dimension_numbers<[1], [0], [0], [1], [0, 0, 1, 1], [], []>} : vector<16x64xf32>, vector<64x128xf32>, vector<16x128xf32> -> vector<16x128xf32>
    %c0_3 = arith.constant 0 : index
    %c0_4 = arith.constant 0 : index
    %3 = vector.load %arg5[%c0_3, %c0_4] : memref<4x128xf32, #tpu.memory_space<vmem>>, vector<1x128xf32>
    %4 = vector.broadcast %3 : vector<1x128xf32> to vector<16x128xf32>
    %5 = arith.addf %2, %4 : vector<16x128xf32>
    %cst_5 = arith.constant 0.000000e+00 : f32
    %6 = vector.broadcast %cst_5 : f32 to vector<16x128xf32>
    %7 = arith.maximumf %5, %6 : vector<16x128xf32>
    %cst_6 = arith.constant dense<0.000000e+00> : vector<16xf32>
    %8 = vector.multi_reduction <add>, %7, %cst_6 [1] : vector<16x128xf32> to vector<16xf32>
    %9 = vector.shape_cast %8 : vector<16xf32> to vector<16x1xf32>
    %cst_7 = arith.constant 3.125000e-02 : f32
    %10 = vector.broadcast %cst_7 : f32 to vector<16x1xf32>
    %11 = arith.mulf %9, %10 : vector<16x1xf32>
    %12 = arith.mulf %7, %7 : vector<16x128xf32>
    %cst_8 = arith.constant dense<0.000000e+00> : vector<16xf32>
    %13 = vector.multi_reduction <add>, %12, %cst_8 [1] : vector<16x128xf32> to vector<16xf32>
    %14 = vector.shape_cast %13 : vector<16xf32> to vector<16x1xf32>
    %cst_9 = arith.constant 3.125000e-02 : f32
    %15 = vector.broadcast %cst_9 : f32 to vector<16x1xf32>
    %16 = arith.mulf %14, %15 : vector<16x1xf32>
    %17 = arith.mulf %11, %11 : vector<16x1xf32>
    %18 = arith.subf %16, %17 : vector<16x1xf32>
    %cst_10 = arith.constant 0.000000e+00 : f32
    %19 = vector.broadcast %cst_10 : f32 to vector<16x1xf32>
    %20 = arith.maximumf %18, %19 : vector<16x1xf32>
    %cst_11 = arith.constant 9.99999974E-6 : f32
    %21 = vector.broadcast %cst_11 : f32 to vector<16x1xf32>
    %22 = arith.addf %20, %21 : vector<16x1xf32>
    %23 = math.rsqrt %22 : vector<16x1xf32>
    %cst_12 = arith.constant 0.000000e+00 : f32
    %24 = vector.broadcast %cst_12 : f32 to vector<16x1xf32>
    %25 = arith.subf %24, %11 : vector<16x1xf32>
    %26 = arith.mulf %25, %23 : vector<16x1xf32>
    %27 = vector.broadcast %23 : vector<16x1xf32> to vector<16x128xf32>
    %28 = arith.mulf %7, %27 : vector<16x128xf32>
    %29 = vector.broadcast %26 : vector<16x1xf32> to vector<16x128xf32>
    %30 = arith.addf %28, %29 : vector<16x128xf32>
    %c0_13 = arith.constant 0 : index
    %c0_14 = arith.constant 0 : index
    %c0_15 = arith.constant 0 : index
    %31 = vector.load %arg3[%c0_13, %c0_14, %c0_15] : memref<3x128x128xf32, #tpu.memory_space<vmem>>, vector<1x128x128xf32>
    %32 = vector.shape_cast %31 : vector<1x128x128xf32> to vector<128x128xf32>
    %cst_16 = arith.constant dense<0.000000e+00> : vector<16x128xf32>
    %33 = tpu.matmul %30, %32, %cst_16 {dimension_numbers = #tpu.dot_dimension_numbers<[1], [0], [0], [1], [0, 0, 1, 1], [], []>} : vector<16x128xf32>, vector<128x128xf32>, vector<16x128xf32> -> vector<16x128xf32>
    %c1 = arith.constant 1 : index
    %c0_17 = arith.constant 0 : index
    %34 = vector.load %arg5[%c1, %c0_17] : memref<4x128xf32, #tpu.memory_space<vmem>>, vector<1x128xf32>
    %35 = vector.broadcast %34 : vector<1x128xf32> to vector<16x128xf32>
    %36 = arith.addf %33, %35 : vector<16x128xf32>
    %cst_18 = arith.constant 0.000000e+00 : f32
    %37 = vector.broadcast %cst_18 : f32 to vector<16x128xf32>
    %38 = arith.maximumf %36, %37 : vector<16x128xf32>
    %cst_19 = arith.constant dense<0.000000e+00> : vector<16xf32>
    %39 = vector.multi_reduction <add>, %38, %cst_19 [1] : vector<16x128xf32> to vector<16xf32>
    %40 = vector.shape_cast %39 : vector<16xf32> to vector<16x1xf32>
    %cst_20 = arith.constant 3.125000e-02 : f32
    %41 = vector.broadcast %cst_20 : f32 to vector<16x1xf32>
    %42 = arith.mulf %40, %41 : vector<16x1xf32>
    %43 = arith.mulf %38, %38 : vector<16x128xf32>
    %cst_21 = arith.constant dense<0.000000e+00> : vector<16xf32>
    %44 = vector.multi_reduction <add>, %43, %cst_21 [1] : vector<16x128xf32> to vector<16xf32>
    %45 = vector.shape_cast %44 : vector<16xf32> to vector<16x1xf32>
    %cst_22 = arith.constant 3.125000e-02 : f32
    %46 = vector.broadcast %cst_22 : f32 to vector<16x1xf32>
    %47 = arith.mulf %45, %46 : vector<16x1xf32>
    %48 = arith.mulf %42, %42 : vector<16x1xf32>
    %49 = arith.subf %47, %48 : vector<16x1xf32>
    %cst_23 = arith.constant 0.000000e+00 : f32
    %50 = vector.broadcast %cst_23 : f32 to vector<16x1xf32>
    %51 = arith.maximumf %49, %50 : vector<16x1xf32>
    %cst_24 = arith.constant 9.99999974E-6 : f32
    %52 = vector.broadcast %cst_24 : f32 to vector<16x1xf32>
    %53 = arith.addf %51, %52 : vector<16x1xf32>
    %54 = math.rsqrt %53 : vector<16x1xf32>
    %cst_25 = arith.constant 0.000000e+00 : f32
    %55 = vector.broadcast %cst_25 : f32 to vector<16x1xf32>
    %56 = arith.subf %55, %42 : vector<16x1xf32>
    %57 = arith.mulf %56, %54 : vector<16x1xf32>
    %58 = vector.broadcast %54 : vector<16x1xf32> to vector<16x128xf32>
    %59 = arith.mulf %38, %58 : vector<16x128xf32>
    %60 = vector.broadcast %57 : vector<16x1xf32> to vector<16x128xf32>
    %61 = arith.addf %59, %60 : vector<16x128xf32>
    %c1_26 = arith.constant 1 : index
    %c0_27 = arith.constant 0 : index
    %c0_28 = arith.constant 0 : index
    %62 = vector.load %arg3[%c1_26, %c0_27, %c0_28] : memref<3x128x128xf32, #tpu.memory_space<vmem>>, vector<1x128x128xf32>
    %63 = vector.shape_cast %62 : vector<1x128x128xf32> to vector<128x128xf32>
    %cst_29 = arith.constant dense<0.000000e+00> : vector<16x128xf32>
    %64 = tpu.matmul %61, %63, %cst_29 {dimension_numbers = #tpu.dot_dimension_numbers<[1], [0], [0], [1], [0, 0, 1, 1], [], []>} : vector<16x128xf32>, vector<128x128xf32>, vector<16x128xf32> -> vector<16x128xf32>
    %c2 = arith.constant 2 : index
    %c0_30 = arith.constant 0 : index
    %65 = vector.load %arg5[%c2, %c0_30] : memref<4x128xf32, #tpu.memory_space<vmem>>, vector<1x128xf32>
    %66 = vector.broadcast %65 : vector<1x128xf32> to vector<16x128xf32>
    %67 = arith.addf %64, %66 : vector<16x128xf32>
    %cst_31 = arith.constant 0.000000e+00 : f32
    %68 = vector.broadcast %cst_31 : f32 to vector<16x128xf32>
    %69 = arith.maximumf %67, %68 : vector<16x128xf32>
    %cst_32 = arith.constant dense<0.000000e+00> : vector<16xf32>
    %70 = vector.multi_reduction <add>, %69, %cst_32 [1] : vector<16x128xf32> to vector<16xf32>
    %71 = vector.shape_cast %70 : vector<16xf32> to vector<16x1xf32>
    %cst_33 = arith.constant 3.125000e-02 : f32
    %72 = vector.broadcast %cst_33 : f32 to vector<16x1xf32>
    %73 = arith.mulf %71, %72 : vector<16x1xf32>
    %74 = arith.mulf %69, %69 : vector<16x128xf32>
    %cst_34 = arith.constant dense<0.000000e+00> : vector<16xf32>
    %75 = vector.multi_reduction <add>, %74, %cst_34 [1] : vector<16x128xf32> to vector<16xf32>
    %76 = vector.shape_cast %75 : vector<16xf32> to vector<16x1xf32>
    %cst_35 = arith.constant 3.125000e-02 : f32
    %77 = vector.broadcast %cst_35 : f32 to vector<16x1xf32>
    %78 = arith.mulf %76, %77 : vector<16x1xf32>
    %79 = arith.mulf %73, %73 : vector<16x1xf32>
    %80 = arith.subf %78, %79 : vector<16x1xf32>
    %cst_36 = arith.constant 0.000000e+00 : f32
    %81 = vector.broadcast %cst_36 : f32 to vector<16x1xf32>
    %82 = arith.maximumf %80, %81 : vector<16x1xf32>
    %cst_37 = arith.constant 9.99999974E-6 : f32
    %83 = vector.broadcast %cst_37 : f32 to vector<16x1xf32>
    %84 = arith.addf %82, %83 : vector<16x1xf32>
    %85 = math.rsqrt %84 : vector<16x1xf32>
    %cst_38 = arith.constant 0.000000e+00 : f32
    %86 = vector.broadcast %cst_38 : f32 to vector<16x1xf32>
    %87 = arith.subf %86, %73 : vector<16x1xf32>
    %88 = arith.mulf %87, %85 : vector<16x1xf32>
    %89 = vector.broadcast %85 : vector<16x1xf32> to vector<16x128xf32>
    %90 = arith.mulf %69, %89 : vector<16x128xf32>
    %91 = vector.broadcast %88 : vector<16x1xf32> to vector<16x128xf32>
    %92 = arith.addf %90, %91 : vector<16x128xf32>
    %c2_39 = arith.constant 2 : index
    %c0_40 = arith.constant 0 : index
    %c0_41 = arith.constant 0 : index
    %93 = vector.load %arg3[%c2_39, %c0_40, %c0_41] : memref<3x128x128xf32, #tpu.memory_space<vmem>>, vector<1x128x128xf32>
    %94 = vector.shape_cast %93 : vector<1x128x128xf32> to vector<128x128xf32>
    %cst_42 = arith.constant dense<0.000000e+00> : vector<16x128xf32>
    %95 = tpu.matmul %92, %94, %cst_42 {dimension_numbers = #tpu.dot_dimension_numbers<[1], [0], [0], [1], [0, 0, 1, 1], [], []>} : vector<16x128xf32>, vector<128x128xf32>, vector<16x128xf32> -> vector<16x128xf32>
    %c3 = arith.constant 3 : index
    %c0_43 = arith.constant 0 : index
    %96 = vector.load %arg5[%c3, %c0_43] : memref<4x128xf32, #tpu.memory_space<vmem>>, vector<1x128xf32>
    %97 = vector.broadcast %96 : vector<1x128xf32> to vector<16x128xf32>
    %98 = arith.addf %95, %97 : vector<16x128xf32>
    %cst_44 = arith.constant 0.000000e+00 : f32
    %99 = vector.broadcast %cst_44 : f32 to vector<16x128xf32>
    %100 = arith.maximumf %98, %99 : vector<16x128xf32>
    %cst_45 = arith.constant dense<0.000000e+00> : vector<16xf32>
    %101 = vector.multi_reduction <add>, %100, %cst_45 [1] : vector<16x128xf32> to vector<16xf32>
    %102 = vector.shape_cast %101 : vector<16xf32> to vector<16x1xf32>
    %cst_46 = arith.constant 3.125000e-02 : f32
    %103 = vector.broadcast %cst_46 : f32 to vector<16x1xf32>
    %104 = arith.mulf %102, %103 : vector<16x1xf32>
    %105 = arith.mulf %100, %100 : vector<16x128xf32>
    %cst_47 = arith.constant dense<0.000000e+00> : vector<16xf32>
    %106 = vector.multi_reduction <add>, %105, %cst_47 [1] : vector<16x128xf32> to vector<16xf32>
    %107 = vector.shape_cast %106 : vector<16xf32> to vector<16x1xf32>
    %cst_48 = arith.constant 3.125000e-02 : f32
    %108 = vector.broadcast %cst_48 : f32 to vector<16x1xf32>
    %109 = arith.mulf %107, %108 : vector<16x1xf32>
    %110 = arith.mulf %104, %104 : vector<16x1xf32>
    %111 = arith.subf %109, %110 : vector<16x1xf32>
    %cst_49 = arith.constant 0.000000e+00 : f32
    %112 = vector.broadcast %cst_49 : f32 to vector<16x1xf32>
    %113 = arith.maximumf %111, %112 : vector<16x1xf32>
    %cst_50 = arith.constant 9.99999974E-6 : f32
    %114 = vector.broadcast %cst_50 : f32 to vector<16x1xf32>
    %115 = arith.addf %113, %114 : vector<16x1xf32>
    %116 = math.rsqrt %115 : vector<16x1xf32>
    %cst_51 = arith.constant 0.000000e+00 : f32
    %117 = vector.broadcast %cst_51 : f32 to vector<16x1xf32>
    %118 = arith.subf %117, %104 : vector<16x1xf32>
    %119 = arith.mulf %118, %116 : vector<16x1xf32>
    %120 = vector.broadcast %116 : vector<16x1xf32> to vector<16x128xf32>
    %121 = arith.mulf %100, %120 : vector<16x128xf32>
    %122 = vector.broadcast %119 : vector<16x1xf32> to vector<16x128xf32>
    %123 = arith.addf %121, %122 : vector<16x128xf32>
    %c0_52 = arith.constant 0 : index
    %c0_53 = arith.constant 0 : index
    %124 = vector.load %arg4[%c0_52, %c0_53] : memref<128x128xf32, #tpu.memory_space<vmem>>, vector<128x128xf32>
    %cst_54 = arith.constant dense<0.000000e+00> : vector<16x128xf32>
    %125 = tpu.matmul %123, %124, %cst_54 {dimension_numbers = #tpu.dot_dimension_numbers<[1], [0], [0], [1], [0, 0, 1, 1], [], []>} : vector<16x128xf32>, vector<128x128xf32>, vector<16x128xf32> -> vector<16x128xf32>
    %c0_55 = arith.constant 0 : index
    %c0_56 = arith.constant 0 : index
    %126 = vector.load %arg6[%c0_55, %c0_56] : memref<1x128xf32, #tpu.memory_space<vmem>>, vector<1x128xf32>
    %127 = vector.broadcast %126 : vector<1x128xf32> to vector<16x128xf32>
    %128 = arith.addf %125, %127 : vector<16x128xf32>
    %c0_57 = arith.constant 0 : index
    %c0_58 = arith.constant 0 : index
    %129 = vector.load %arg7[%c0_57, %c0_58] : memref<16x128xf32, #tpu.memory_space<vmem>>, vector<16x128xf32>
    tpu.vector_store %arg7[%c0_57, %c0_58], %128 {strides = array<i32>} : memref<16x128xf32, #tpu.memory_space<vmem>>, vector<16x128xf32>,
    return
  }
  func.func @transform_0(%arg0: i32) -> (i32, i32) {
    %c0_i32 = arith.constant 0 : i32
    %c0_i32_0 = arith.constant 0 : i32
    return %arg0, %c0_i32 : i32, i32
  }
  func.func @transform_1(%arg0: i32) -> (i32, i32) {
    %c0_i32 = arith.constant 0 : i32
    %c0_i32_0 = arith.constant 0 : i32
    %c0_i32_1 = arith.constant 0 : i32
    return %c0_i32, %c0_i32_0 : i32, i32
  }
  func.func @transform_2(%arg0: i32) -> (i32, i32, i32) {
    %c0_i32 = arith.constant 0 : i32
    %c0_i32_0 = arith.constant 0 : i32
    %c0_i32_1 = arith.constant 0 : i32
    %c0_i32_2 = arith.constant 0 : i32
    return %c0_i32, %c0_i32_0, %c0_i32_1 : i32, i32, i32
  }
  func.func @transform_3(%arg0: i32) -> (i32, i32) {
    %c0_i32 = arith.constant 0 : i32
    %c0_i32_0 = arith.constant 0 : i32
    %c0_i32_1 = arith.constant 0 : i32
    return %c0_i32, %c0_i32_0 : i32, i32
  }
  func.func @transform_4(%arg0: i32) -> (i32, i32) {
    %c0_i32 = arith.constant 0 : i32
    %c0_i32_0 = arith.constant 0 : i32
    %c0_i32_1 = arith.constant 0 : i32
    return %c0_i32, %c0_i32_0 : i32, i32
  }
  func.func @transform_5(%arg0: i32) -> (i32, i32) {
    %c0_i32 = arith.constant 0 : i32
    %c0_i32_0 = arith.constant 0 : i32
    %c0_i32_1 = arith.constant 0 : i32
    return %c0_i32, %c0_i32_0 : i32, i32
  }
  func.func @transform_6(%arg0: i32) -> (i32, i32) {
    %c0_i32 = arith.constant 0 : i32
    %c0_i32_0 = arith.constant 0 : i32
    return %arg0, %c0_i32 : i32, i32
  }
}

</mosaic_0001>

<bundles_post_ra>
// kernel: tpu_custom_call.1
= control target key start
LH: loop header
LB: loop body
LE: loop exit
PB: predicated region body
PF: predicated region fallthrough
CT: control target
= control target key end

     0   :  { %11 = vsyncpa [#allocation3], 0  ;;  %s1450_s0 = inlined_call_operand.hbm [shape: f32[16,64], index: 0, kind: input, shape index: {}]   ;;  %s1451_s1 = inlined_call_operand.hbm [shape: f32[64,128], index: 1, kind: input, shape index: {}]   ;;  %s1452_s2 = inlined_call_operand.hbm [shape: f32[3,128,128], index: 2, kind: input, shape index: {}]   ;;  %s1453_s3 = inlined_call_operand.hbm [shape: f32[128,128], index: 3, kind: input, shape index: {}]   ;;  %s1454_s4 = inlined_call_operand.vmem [shape: f32[4,128], index: 4, kind: input, shape index: {}]   ;;  %s1455_s5 = inlined_call_operand.vmem [shape: f32[1,128], index: 5, kind: input, shape index: {}]   ;;  %s1456_s6 = inlined_call_operand.hbm [shape: f32[16,128], index: 6, kind: output, shape index: {}]  }
   0x1   :  { %12 = vsyncpa [#allocation6], 0 }
   0x2   :  { %13 = vsyncpa [#allocation9], 0 }
   0x3   :  { %14 = vsyncpa [#allocation4], 0  ;;  %s1254_s21 = smov [#allocation5]   ;;  %s1255_s23 = smov [#allocation2]  }
   0x4   :  { %s32_s22 = sshll.u32 %s1254_s21, 4  ;;  %s20_s24 = sshll.u32 %s1255_s23, 4  ;;  %s33_s22 = int_to_ptr.vmem [resolvable:$true] %s32_s22  ;;  %s1296_s24 = int_to_ptr.vmem [resolvable:$true] %s20_s24 }
   0x5   :  { %s1136_s27 = scalar_lea.hbm %s1451_s1, 1024 }
   0x6   :  { %p1137_p0 = scmp.ne.s32.totalorder %s1451_s1, %s1136_s27  ;;  %p1140_p1 = scmp.lt.u32.totalorder %s1136_s27, %s1451_s1 }
   0x8   :  { %p1142_p2 = pnand %p1140_p1, %p1137_p0 }
   0xa   :  { %1145 = shalt.err (!%p1142_p2)
}
   0xb   :  { %s1146_s8 = scalar_lea.vmem %s33_s22, 1024  ;;  %p1151_p4 = scmp.lt.s32.totalorder %s33_s22, %s33_s22 }
   0xc   :  { %p1147_p3 = scmp.ne.s32.totalorder %s33_s22, %s1146_s8  ;;  %p1152_p5 = scmp.lt.s32.totalorder %s1146_s8, %s1146_s8 }
   0xe   :  { %p1153_p6 = por %p1152_p5, %p1151_p4 }
  0x10   :  { %p1154_p7 = pnand %p1153_p6, %p1147_p3 }
  0x12   :  { %1157 = shalt.err (!%p1154_p7)
}
  0x13   :  { %s1256_s9 = smov 128   ;;  %s1257_s10 = smov 8  }
  0x14   :  { %38 = dma.hbm_to_vmem [thread:$0]  %s1451_s1, 1024, %s33_s22, [#allocation6], %s1256_s9, %s1256_s9, %s1257_s10  }
  0x15   :  { %s1158_s15 = scalar_lea.hbm %s1450_s0, 256 }
  0x16   :  { %p1159_p8 = scmp.ne.s32.totalorder %s1450_s0, %s1158_s15  ;;  %p1162_p9 = scmp.lt.u32.totalorder %s1158_s15, %s1450_s0 }
  0x18   :  { %p1164_p10 = pnand %p1162_p9, %p1159_p8 }
  0x1a   :  { %1167 = shalt.err (!%p1164_p10)
}
  0x1b   :  { %s1168_s20 = scalar_lea.vmem %s1296_s24, 256  ;;  %p1173_p12 = scmp.lt.s32.totalorder %s1296_s24, %s1296_s24 }
  0x1c   :  { %p1169_p11 = scmp.ne.s32.totalorder %s1296_s24, %s1168_s20  ;;  %p1174_p13 = scmp.lt.s32.totalorder %s1168_s20, %s1168_s20 }
  0x1e   :  { %p1175_p0 = por %p1174_p13, %p1173_p12 }
  0x20   :  { %p1176_p1 = pnand %p1175_p0, %p1169_p11 }
  0x22   :  { %1179 = shalt.err (!%p1176_p1)
}
  0x23   :  { %26 = dma.hbm_to_vmem [thread:$0]  %s1450_s0, 256, %s1296_s24, [#allocation3], %s1256_s9, %s1256_s9, %s1257_s10  }
  0x24   :  { %s1258_s22 = smov [#allocation7]   ;;  %s1259_s25 = smov [#allocation8]  }
  0x25   :  { %s44_s23 = sshll.u32 %s1258_s22, 4  ;;  %s56_s26 = sshll.u32 %s1259_s25, 4  ;;  %s45_s23 = int_to_ptr.vmem [resolvable:$true] %s44_s23  ;;  %s1333_s26 = int_to_ptr.vmem [resolvable:$true] %s56_s26 }
  0x26   :  { %s1180_s29 = scalar_lea.hbm %s1452_s2, 6144 }
  0x27   :  { %p1181_p2 = scmp.ne.s32.totalorder %s1452_s2, %s1180_s29  ;;  %p1184_p3 = scmp.lt.u32.totalorder %s1180_s29, %s1452_s2 }
  0x29   :  { %p1186_p4 = pnand %p1184_p3, %p1181_p2 }
  0x2b   :  { %1189 = shalt.err (!%p1186_p4)
}
  0x2c   :  { %s1190_s0 = scalar_lea.vmem %s45_s23, 6144  ;;  %p1195_p6 = scmp.lt.s32.totalorder %s45_s23, %s45_s23 }
  0x2d   :  { %p1191_p5 = scmp.ne.s32.totalorder %s45_s23, %s1190_s0  ;;  %p1196_p7 = scmp.lt.s32.totalorder %s1190_s0, %s1190_s0 }
  0x2f   :  { %p1197_p8 = por %p1196_p7, %p1195_p6 }
  0x31   :  { %p1198_p9 = pnand %p1197_p8, %p1191_p5 }
  0x33   :  { %1201 = shalt.err (!%p1198_p9)
}
  0x34   :  { %50 = dma.hbm_to_vmem [thread:$0]  %s1452_s2, 6144, %s45_s23, [#allocation6], %s1256_s9, %s1256_s9, %s1257_s10  }
  0x35   :  { %s1202_s15 = scalar_lea.hbm %s1453_s3, 2048 }
  0x36   :  { %p1203_p10 = scmp.ne.s32.totalorder %s1453_s3, %s1202_s15  ;;  %p1206_p11 = scmp.lt.u32.totalorder %s1202_s15, %s1453_s3 }
  0x38   :  { %p1208_p12 = pnand %p1206_p11, %p1203_p10 }
  0x3a   :  { %1211 = shalt.err (!%p1208_p12)
}
  0x3b   :  { %s1212_s20 = scalar_lea.vmem %s1333_s26, 2048  ;;  %p1217_p0 = scmp.lt.s32.totalorder %s1333_s26, %s1333_s26 }
  0x3c   :  { %p1213_p13 = scmp.ne.s32.totalorder %s1333_s26, %s1212_s20  ;;  %p1218_p1 = scmp.lt.s32.totalorder %s1212_s20, %s1212_s20 }
  0x3e   :  { %p1219_p2 = por %p1218_p1, %p1217_p0 }
  0x40   :  { %p1220_p3 = pnand %p1219_p2, %p1213_p13 }
  0x42   :  { %1223 = shalt.err (!%p1220_p3)
}
  0x43   :  { %62 = dma.hbm_to_vmem [thread:$0]  %s1453_s3, 2048, %s1333_s26, [#allocation9], %s1256_s9, %s1256_s9, %s1257_s10  }
  0x44   :  { %1246 = dma.done.wait [#allocation3], 256  }
  0x45   :  { %1247 = vsyncadd [#allocation3], 4294967040 }
  0x46   :  { %1248 = dma.done.wait [#allocation6], 7168  }
  0x47   :  { %1249 = vsyncadd [#allocation6], 4294960128 }
  0x48   :  { %1250 = dma.done.wait [#allocation9], 2048  }
  0x49   :  { %1251 = vsyncadd [#allocation9], 4294965248  ;;  %v81_v0 = vld [vmem:[#allocation5] sm:$0xff]  ;;  %v82_v1 = vld [vmem:[#allocation5 + $0x8] sm:$0xff]  ;;  %vm94_vm0 = vcmask 523264   ;;  %s1260_s30 = smov [#allocation10]  }
  0x4a   :  { %v83_v2 = vld [vmem:[#allocation5 + $0x10] sm:$0xff]  ;;  %v969_v3 = vpack.c.bf16 %v82_v1, %v81_v0  ;;  %v84_v4 = vld [vmem:[#allocation5 + $0x18] sm:$0xff]  ;;  %v85_v6 = vld [vmem:[#allocation5 + $0x20] sm:$0xff]  ;;  %s707_s7 = sshll.u32 %s1260_s30, 4  ;;  %s708_s7 = int_to_ptr.vmem [resolvable:$true] %s707_s7 }
  0x4b   :  { %v973_v5 = vpack.c.bf16 %v84_v4, %v83_v2  ;;  %v86_v7 = vld [vmem:[#allocation5 + $0x28] sm:$0xff]  ;;  %v79_v8 = vld [vmem:[#allocation2] sm:$0xff]  ;;  %v88_v11 = vld [vmem:[#allocation5 + $0x38] sm:$0xff]  ;;  %s1224_s8 = scalar_lea.vmem %s708_s7, 256  ;;  %p1229_p5 = scmp.lt.s32.totalorder %s708_s7, %s708_s7 }
  0x4c   :  { %970 = vmatprep.subr.bf16.mxu0 %v969_v3  ;;  %826 = vmatprep.mubr.msk.f32.mxu0 %vm94_vm0, %v79_v8  ;;  %v977_v9 = vpack.c.bf16 %v86_v7, %v85_v6  ;;  %v87_v10 = vld [vmem:[#allocation5 + $0x30] sm:$0xff]  ;;  %v80_v13 = vld [vmem:[#allocation2 + $0x8] sm:$0xff]  ;;  %v210_v14 = vld [vmem:[#allocation7] sm:$0xff]  ;;  %p1225_p4 = scmp.ne.s32.totalorder %s708_s7, %s1224_s8  ;;  %p1230_p6 = scmp.lt.s32.totalorder %s1224_s8, %s1224_s8 }
  0x4d   :  { %972 = vmatpush3.bf16.msra.mxu0 %v969_v3  ;;  %v981_v12 = vpack.c.bf16 %v88_v11, %v87_v10  ;;  %v211_v15 = vld [vmem:[#allocation7 + $0x8] sm:$0xff]  ;;  %v721_v17 = vld [vmem:[%s1454_s4] ss:$0 sm:$0xff]  ;;  %v213_v27 = vld [vmem:[#allocation7 + $0x18] sm:$0xff] }
  0x4e   :  { %974 = vmatprep.subr.bf16.mxu0 %v973_v5  ;;  %v985_v16 = vpack.c.bf16 %v211_v15, %v210_v14  ;;  %v212_v26 = vld [vmem:[#allocation7 + $0x10] sm:$0xff]  ;;  %v214_v29 = vld [vmem:[#allocation7 + $0x20] sm:$0xff]  ;;  %v215_v30 = vld [vmem:[#allocation7 + $0x28] sm:$0xff]  ;;  %p1231_p7 = por %p1230_p6, %p1229_p5 }
  0x4f   :  { %v989_v28 = vpack.c.bf16 %v213_v27, %v212_v26  ;;  %v993_v31 = vpack.c.bf16 %v215_v30, %v214_v29  ;;  %v216_v32 = vld [vmem:[#allocation7 + $0x30] sm:$0xff]  ;;  %v217_v33 = vld [vmem:[#allocation7 + $0x38] sm:$0xff]  ;;  %v218_v35 = vld [vmem:[#allocation7 + $0x40] sm:$0xff] }
  0x50   :  { %986 = vmatprep.subr.bf16.mxu1 %v985_v16  ;;  %v997_v34 = vpack.c.bf16 %v217_v33, %v216_v32  ;;  %v219_v36 = vld [vmem:[#allocation7 + $0x48] sm:$0xff]  ;;  %v220_v38 = vld [vmem:[#allocation7 + $0x50] sm:$0xff]  ;;  %v221_v39 = vld [vmem:[#allocation7 + $0x58] sm:$0xff]  ;;  %p1232_p8 = pnand %p1231_p7, %p1225_p4 }
  0x51   :  { %976 = vmatpush3.bf16.msra.mxu0 %v973_v5  ;;  %988 = vmatpush3.bf16.msra.mxu1 %v985_v16  ;;  %v1001_v37 = vpack.c.bf16 %v219_v36, %v218_v35  ;;  %v222_v40 = vld [vmem:[#allocation7 + $0x60] sm:$0xff]  ;;  %v1005_v41 = vpack.c.bf16 %v221_v39, %v220_v38  ;;  %v223_v42 = vld [vmem:[#allocation7 + $0x68] sm:$0xff]  ;;  %v224_v44 = vld [vmem:[#allocation7 + $0x70] sm:$0xff] }
  0x52   :  { %978 = vmatprep.subr.bf16.mxu0 %v977_v9  ;;  %990 = vmatprep.subr.bf16.mxu1 %v989_v28  ;;  %v1009_v43 = vpack.c.bf16 %v223_v42, %v222_v40  ;;  %v225_v45 = vld [vmem:[#allocation7 + $0x78] sm:$0xff]  ;;  %v342_v10 = vld [vmem:[#allocation7 + $0x88] sm:$0xff]  ;;  %v347_v27 = vld [vmem:[#allocation7 + $0xb0] sm:$0xff] }
  0x53   :  { %v1013_v46 = vpack.c.bf16 %v225_v45, %v224_v44  ;;  %v349_v30 = vld [vmem:[#allocation7 + $0xc0] sm:$0xff]  ;;  %v351_v33 = vld [vmem:[#allocation7 + $0xd0] sm:$0xff]  ;;  %v356_v40 = vld [vmem:[#allocation7 + $0xf8] sm:$0xff] }
  0x54   :  { %v353_v35 = vld [vmem:[#allocation7 + $0xe0] sm:$0xff]  ;;  %v355_v39 = vld [vmem:[#allocation7 + $0xf0] sm:$0xff] }
  0x55   :  { %980 = vmatpush3.bf16.msra.mxu0 %v977_v9  ;;  %992 = vmatpush3.bf16.msra.mxu1 %v989_v28  ;;  %v341_v9 = vld [vmem:[#allocation7 + $0x80] sm:$0xff]  ;;  %v348_v28 = vld [vmem:[#allocation7 + $0xb8] sm:$0xff] }
  0x56   :  { %982 = vmatprep.subr.bf16.mxu0 %v981_v12  ;;  %994 = vmatprep.subr.bf16.mxu1 %v993_v31  ;;  %v1017_v11 = vpack.c.bf16 %v342_v10, %v341_v9  ;;  %v1029_v29 = vpack.c.bf16 %v348_v28, %v347_v27  ;;  %v482_v28 = vld [vmem:[#allocation7 + $0x150] sm:$0xff] }
  0x59   :  { %984 = vmatpush3.bf16.msra.mxu0 %v981_v12  ;;  %996 = vmatpush3.bf16.msra.mxu1 %v993_v31  ;;  %v724_v12 = vld [vmem:[%s1454_s4 + $0x1] ss:$0 sm:$0xff]  ;;  %v350_v31 = vld [vmem:[#allocation7 + $0xc8] sm:$0xff] }
  0x5a   :  { %998 = vmatprep.subr.bf16.mxu1 %v997_v34  ;;  %1018 = vmatprep.subr.bf16.mxu0 %v1017_v11  ;;  %v1033_v32 = vpack.c.bf16 %v350_v31, %v349_v30  ;;  %v484_v30 = vld [vmem:[#allocation7 + $0x160] sm:$0xff] }
  0x5c   :  { %827 = vmatmul.mubr.msk.f32.vlgmr.msra.gmra.mrb[0].mxu0 %vm94_vm0, %v80_v13 }
  0x5d   :  { %1000 = vmatpush3.bf16.msra.mxu1 %v997_v34  ;;  %1020 = vmatpush3.bf16.msra.mxu0 %v1017_v11  ;;  %v352_v34 = vld [vmem:[#allocation7 + $0xd8] sm:$0xff] }
  0x5e   :  { %1002 = vmatprep.subr.bf16.mxu1 %v1001_v37  ;;  %v1037_v36 = vpack.c.bf16 %v352_v34, %v351_v33  ;;  %v486_v34 = vld [vmem:[#allocation7 + $0x170] sm:$0xff] }
  0x61   :  { %1004 = vmatpush3.bf16.msra.mxu1 %v1001_v37  ;;  %v354_v37 = vld [vmem:[#allocation7 + $0xe8] sm:$0xff] }
  0x62   :  { %1006 = vmatprep.subr.bf16.mxu1 %v1005_v41  ;;  %v1041_v38 = vpack.c.bf16 %v354_v37, %v353_v35  ;;  %v487_v35 = vld [vmem:[#allocation7 + $0x178] sm:$0xff] }
  0x65   :  { %1008 = vmatpush3.bf16.msra.mxu1 %v1005_v41  ;;  %v1045_v41 = vpack.c.bf16 %v356_v40, %v355_v39 }
  0x66   :  { %1010 = vmatprep.subr.bf16.mxu1 %v1009_v43 }
  0x69   :  { %1012 = vmatpush3.bf16.msra.mxu1 %v1009_v43 }
  0x6a   :  { %1014 = vmatprep.subr.bf16.mxu1 %v1013_v46 }
  0x6d   :  { %1016 = vmatpush3.bf16.msra.mxu1 %v1013_v46 }
 0x12f   :  { %v828_v18 = vpop.f32.mrb[0].mxu0 }
 0x130   :  { %v167_v19 = vpop.f32.mrb[1].mxu0  ;;  %v173_v20 = vadd.f32 %v828_v18, %v721_v17 }
 0x131   :  { %v168_v21 = vadd.f32 %v721_v17, %v167_v19 }
 0x132   :  { %v1377_v23 = vmax.f32 %v173_v20, 0.0 }
 0x133   :  { %v1375_v22 = vmax.f32 %v168_v21, 0.0  ;;  %v343_v21 = vld [vmem:[#allocation7 + $0x90] sm:$0xff] }
 0x134   :  { %v185_v25 = vmul.f32 %v1377_v23, %v1377_v23 }
 0x135   :  { %178 = vadd.xlane.f32.xlu0 %v1375_v22  ;;  %v184_v24 = vmul.f32 %v1375_v22, %v1375_v22 }
 0x137   :  { %186 = vadd.xlane.f32.xlu1 %v184_v24  ;;  %v345_v24 = vld [vmem:[#allocation7 + $0xa0] sm:$0xff] }
 0x139   :  { %180 = vadd.xlane.f32.xlu0 %v1377_v23 }
 0x13b   :  { %188 = vadd.xlane.f32.xlu1 %v185_v25  ;;  %v346_v25 = vld [vmem:[#allocation7 + $0xa8] sm:$0xff] }
 0x13c   :  { %v1025_v26 = vpack.c.bf16 %v346_v25, %v345_v24  ;;  %v480_v25 = vld [vmem:[#allocation7 + $0x140] sm:$0xff] }
 0x1c2   :  { %v179_v47 = vpop.xlane.xlu0 %178 }
 0x1c3   :  { %v182_v48 = vmul.f32 0.03125, %v179_v47 }
 0x1c4   :  { %v187_v49 = vpop.xlane.xlu1 %186 }
 0x1c5   :  { %v192_v50 = vmul.f32 %v182_v48, %v182_v48  ;;  %v190_v51 = vmul.f32 0.03125, %v187_v49  ;;  %v202_v63 = vsub.f32 0.0, %v182_v48 }
 0x1c6   :  { %v181_v52 = vpop.xlane.xlu0 %180 }
 0x1c7   :  { %v194_v53 = vsub.f32 %v190_v51, %v192_v50  ;;  %v183_v54 = vmul.f32 0.03125, %v181_v52 }
 0x1c8   :  { %v189_v55 = vpop.xlane.xlu1 %188 }
 0x1c9   :  { %v196_v56 = vmax.f32 %v194_v53, 0.0  ;;  %v193_v57 = vmul.f32 %v183_v54, %v183_v54  ;;  %v191_v58 = vmul.f32 0.03125, %v189_v55  ;;  %v203_v3 = vsub.f32 0.0, %v183_v54 }
 0x1cb   :  { %v198_v59 = vadd.f32 1e-05, %v196_v56  ;;  %v195_v60 = vsub.f32 %v191_v58, %v193_v57 }
 0x1cd   :  { %1120 = vrsqrt.f32 %v198_v59  ;;  %v197_v61 = vmax.f32 %v195_v60, 0.0 }
 0x1cf   :  { %v199_v62 = vadd.f32 1e-05, %v197_v61 }
 0x1d1   :  { %1122 = vrsqrt.f32 %v199_v62 }
 0x1d7   :  { %v1121_v0 = vpop.eup %1120 }
 0x1d8   :  { %v204_v1 = vmul.f32 %v1121_v0, %v202_v63  ;;  %v206_v2 = vmul.f32 %v1121_v0, %v1375_v22  ;;  %v344_v22 = vld [vmem:[#allocation7 + $0x98] sm:$0xff] }
 0x1da   :  { %v208_v4 = vadd.f32 %v206_v2, %v204_v1 }
 0x1db   :  { %v1123_v5 = vpop.eup %1122 }
 0x1dc   :  { %861 = vmatprep.mubr.f32.mxu1 %v208_v4  ;;  %v205_v6 = vmul.f32 %v1123_v5, %v203_v3  ;;  %v207_v7 = vmul.f32 %v1123_v5, %v1377_v23  ;;  %v1021_v23 = vpack.c.bf16 %v344_v22, %v343_v21  ;;  %v472_v4 = vld [vmem:[#allocation7 + $0x100] sm:$0xff]  ;;  %v473_v5 = vld [vmem:[#allocation7 + $0x108] sm:$0xff]  ;;  %v478_v22 = vld [vmem:[#allocation7 + $0x130] sm:$0xff] }
 0x1de   :  { %v209_v8 = vadd.f32 %v207_v7, %v205_v6  ;;  %1022 = vmatprep.subr.bf16.mxu0 %v1021_v23  ;;  %v1049_v6 = vpack.c.bf16 %v473_v5, %v472_v4  ;;  %v725_v7 = vld [vmem:[%s1454_s4 + $0x2] ss:$0 sm:$0xff] }
 0x1df   :  { %1024 = vmatpush3.bf16.msra.mxu0 %v1021_v23  ;;  %v479_v23 = vld [vmem:[#allocation7 + $0x138] sm:$0xff] }
 0x1e0   :  { %862 = vmatmul.mubr.f32.vlgmr.msra.gmra.mrb[0].mxu1 %v209_v8  ;;  %1026 = vmatprep.subr.bf16.mxu0 %v1025_v26  ;;  %v1061_v24 = vpack.c.bf16 %v479_v23, %v478_v22  ;;  %v612_v23 = vld [vmem:[#allocation8 + $0x50] sm:$0xff] }
 0x1e1   :  { %1050 = vmatprep.subr.bf16.mxu1 %v1049_v6 }
 0x1e2   :  { %1052 = vmatpush3.bf16.msra.mxu1 %v1049_v6 }
 0x1e3   :  { %1028 = vmatpush3.bf16.msra.mxu0 %v1025_v26  ;;  %v481_v26 = vld [vmem:[#allocation7 + $0x148] sm:$0xff] }
 0x1e4   :  { %1030 = vmatprep.subr.bf16.mxu0 %v1029_v29  ;;  %v1065_v27 = vpack.c.bf16 %v481_v26, %v480_v25  ;;  %v614_v25 = vld [vmem:[#allocation8 + $0x60] sm:$0xff] }
 0x1e7   :  { %1032 = vmatpush3.bf16.msra.mxu0 %v1029_v29  ;;  %v483_v29 = vld [vmem:[#allocation7 + $0x158] sm:$0xff] }
 0x1e8   :  { %1034 = vmatprep.subr.bf16.mxu0 %v1033_v32  ;;  %v1069_v31 = vpack.c.bf16 %v483_v29, %v482_v28  ;;  %v616_v29 = vld [vmem:[#allocation8 + $0x70] sm:$0xff] }
 0x1eb   :  { %1036 = vmatpush3.bf16.msra.mxu0 %v1033_v32  ;;  %v485_v32 = vld [vmem:[#allocation7 + $0x168] sm:$0xff] }
 0x1ec   :  { %1038 = vmatprep.subr.bf16.mxu0 %v1037_v36  ;;  %v1073_v33 = vpack.c.bf16 %v485_v32, %v484_v30  ;;  %v617_v30 = vld [vmem:[#allocation8 + $0x78] sm:$0xff] }
 0x1ef   :  { %1040 = vmatpush3.bf16.msra.mxu0 %v1037_v36  ;;  %v1077_v36 = vpack.c.bf16 %v487_v35, %v486_v34 }
 0x1f0   :  { %1042 = vmatprep.subr.bf16.mxu0 %v1041_v38 }
 0x1f3   :  { %1044 = vmatpush3.bf16.msra.mxu0 %v1041_v38 }
 0x1f4   :  { %1046 = vmatprep.subr.bf16.mxu0 %v1045_v41 }
 0x1f7   :  { %1048 = vmatpush3.bf16.msra.mxu0 %v1045_v41 }
 0x2b3   :  { %v863_v13 = vpop.f32.mrb[0].mxu1 }
 0x2b4   :  { %v303_v14 = vadd.f32 %v863_v13, %v724_v12  ;;  %v297_v15 = vpop.f32.mrb[1].mxu1 }
 0x2b5   :  { %v298_v16 = vadd.f32 %v724_v12, %v297_v15 }
 0x2b6   :  { %v1390_v17 = vmax.f32 %v303_v14, 0.0 }
 0x2b7   :  { %v1392_v18 = vmax.f32 %v298_v16, 0.0  ;;  %v474_v16 = vld [vmem:[#allocation7 + $0x110] sm:$0xff] }
 0x2b8   :  { %310 = vadd.xlane.f32.xlu1 %v1390_v17  ;;  %v315_v19 = vmul.f32 %v1390_v17, %v1390_v17 }
 0x2b9   :  { %308 = vadd.xlane.f32.xlu0 %v1392_v18  ;;  %v314_v20 = vmul.f32 %v1392_v18, %v1392_v18 }
 0x2bc   :  { %318 = vadd.xlane.f32.xlu1 %v315_v19  ;;  %v476_v19 = vld [vmem:[#allocation7 + $0x120] sm:$0xff] }
 0x2bd   :  { %316 = vadd.xlane.f32.xlu0 %v314_v20  ;;  %v477_v20 = vld [vmem:[#allocation7 + $0x128] sm:$0xff] }
 0x2be   :  { %v1057_v21 = vpack.c.bf16 %v477_v20, %v476_v19  ;;  %v610_v20 = vld [vmem:[#allocation8 + $0x40] sm:$0xff] }
 0x345   :  { %v311_v42 = vpop.xlane.xlu1 %310 }
 0x346   :  { %v313_v43 = vmul.f32 0.03125, %v311_v42  ;;  %v309_v44 = vpop.xlane.xlu0 %308 }
 0x347   :  { %v312_v45 = vmul.f32 0.03125, %v309_v44 }
 0x348   :  { %v323_v47 = vmul.f32 %v313_v43, %v313_v43  ;;  %v333_v58 = vsub.f32 0.0, %v313_v43 }
 0x349   :  { %v319_v46 = vpop.xlane.xlu1 %318  ;;  %v322_v50 = vmul.f32 %v312_v45, %v312_v45  ;;  %v332_v60 = vsub.f32 0.0, %v312_v45 }
 0x34a   :  { %v321_v48 = vmul.f32 0.03125, %v319_v46  ;;  %v317_v49 = vpop.xlane.xlu0 %316 }
 0x34b   :  { %v320_v51 = vmul.f32 0.03125, %v317_v49 }
 0x34c   :  { %v325_v52 = vsub.f32 %v321_v48, %v323_v47 }
 0x34d   :  { %v324_v53 = vsub.f32 %v320_v51, %v322_v50 }
 0x34e   :  { %v327_v54 = vmax.f32 %v325_v52, 0.0 }
 0x34f   :  { %v326_v55 = vmax.f32 %v324_v53, 0.0 }
 0x350   :  { %v329_v56 = vadd.f32 1e-05, %v327_v54 }
 0x351   :  { %v328_v57 = vadd.f32 1e-05, %v326_v55 }
 0x352   :  { %1124 = vrsqrt.f32 %v329_v56 }
 0x353   :  { %1126 = vrsqrt.f32 %v328_v57 }
 0x35c   :  { %v1125_v59 = vpop.eup %1124 }
 0x35d   :  { %v1127_v61 = vpop.eup %1126  ;;  %v335_v62 = vmul.f32 %v1125_v59, %v333_v58  ;;  %v337_v63 = vmul.f32 %v1125_v59, %v1390_v17  ;;  %v475_v17 = vld [vmem:[#allocation7 + $0x118] sm:$0xff] }
 0x35e   :  { %v334_v0 = vmul.f32 %v1127_v61, %v332_v60  ;;  %v336_v1 = vmul.f32 %v1127_v61, %v1392_v18  ;;  %v1053_v18 = vpack.c.bf16 %v475_v17, %v474_v16  ;;  %v608_v17 = vld [vmem:[#allocation8 + $0x30] sm:$0xff] }
 0x35f   :  { %v339_v3 = vadd.f32 %v337_v63, %v335_v62  ;;  %v602_v63 = vld [vmem:[#allocation8] sm:$0xff] }
 0x360   :  { %v338_v2 = vadd.f32 %v336_v1, %v334_v0  ;;  %1054 = vmatprep.subr.bf16.mxu1 %v1053_v18  ;;  %v603_v0 = vld [vmem:[#allocation8 + $0x8] sm:$0xff] }
 0x361   :  { %1056 = vmatpush3.bf16.msra.mxu1 %v1053_v18  ;;  %v1081_v1 = vpack.c.bf16 %v603_v0, %v602_v63  ;;  %v609_v18 = vld [vmem:[#allocation8 + $0x38] sm:$0xff] }
 0x362   :  { %896 = vmatprep.mubr.f32.mxu0 %v338_v2  ;;  %1058 = vmatprep.subr.bf16.mxu1 %v1057_v21  ;;  %v726_v2 = vld [vmem:[%s1454_s4 + $0x3] ss:$0 sm:$0xff]  ;;  %v1093_v19 = vpack.c.bf16 %v609_v18, %v608_v17 }
 0x363   :  { %897 = vmatmul.mubr.f32.vlgmr.msra.gmra.mrb[2].mxu0 %v339_v3  ;;  %1082 = vmatprep.subr.bf16.mxu0 %v1081_v1 }
 0x364   :  { %1084 = vmatpush3.bf16.msra.mxu0 %v1081_v1 }
 0x365   :  { %1060 = vmatpush3.bf16.msra.mxu1 %v1057_v21  ;;  %v611_v21 = vld [vmem:[#allocation8 + $0x48] sm:$0xff] }
 0x366   :  { %1062 = vmatprep.subr.bf16.mxu1 %v1061_v24  ;;  %v1097_v22 = vpack.c.bf16 %v611_v21, %v610_v20 }
 0x369   :  { %1064 = vmatpush3.bf16.msra.mxu1 %v1061_v24  ;;  %v613_v24 = vld [vmem:[#allocation8 + $0x58] sm:$0xff] }
 0x36a   :  { %1066 = vmatprep.subr.bf16.mxu1 %v1065_v27  ;;  %v1101_v26 = vpack.c.bf16 %v613_v24, %v612_v23 }
 0x36d   :  { %1068 = vmatpush3.bf16.msra.mxu1 %v1065_v27  ;;  %v615_v27 = vld [vmem:[#allocation8 + $0x68] sm:$0xff] }
 0x36e   :  { %1070 = vmatprep.subr.bf16.mxu1 %v1069_v31  ;;  %v1105_v28 = vpack.c.bf16 %v615_v27, %v614_v25 }
 0x371   :  { %1072 = vmatpush3.bf16.msra.mxu1 %v1069_v31  ;;  %v1109_v31 = vpack.c.bf16 %v617_v30, %v616_v29 }
 0x372   :  { %1074 = vmatprep.subr.bf16.mxu1 %v1073_v33 }
 0x375   :  { %1076 = vmatpush3.bf16.msra.mxu1 %v1073_v33 }
 0x376   :  { %1078 = vmatprep.subr.bf16.mxu1 %v1077_v36 }
 0x379   :  { %1080 = vmatpush3.bf16.msra.mxu1 %v1077_v36 }
 0x436   :  { %v898_v8 = vpop.f32.mrb[2].mxu0 }
 0x437   :  { %v434_v9 = vadd.f32 %v898_v8, %v725_v7  ;;  %v428_v10 = vpop.f32.mrb[3].mxu0 }
 0x438   :  { %v429_v11 = vadd.f32 %v725_v7, %v428_v10 }
 0x439   :  { %v1405_v12 = vmax.f32 %v434_v9, 0.0 }
 0x43a   :  { %v1407_v13 = vmax.f32 %v429_v11, 0.0  ;;  %v604_v11 = vld [vmem:[#allocation8 + $0x10] sm:$0xff] }
 0x43b   :  { %441 = vadd.xlane.f32.xlu1 %v1405_v12  ;;  %v446_v14 = vmul.f32 %v1405_v12, %v1405_v12 }
 0x43c   :  { %439 = vadd.xlane.f32.xlu0 %v1407_v13  ;;  %v445_v15 = vmul.f32 %v1407_v13, %v1407_v13 }
 0x43f   :  { %449 = vadd.xlane.f32.xlu1 %v446_v14  ;;  %v606_v14 = vld [vmem:[#allocation8 + $0x20] sm:$0xff] }
 0x440   :  { %447 = vadd.xlane.f32.xlu0 %v445_v15  ;;  %v607_v15 = vld [vmem:[#allocation8 + $0x28] sm:$0xff] }
 0x441   :  { %v1089_v16 = vpack.c.bf16 %v607_v15, %v606_v14 }
 0x4c8   :  { %v442_v37 = vpop.xlane.xlu1 %441 }
 0x4c9   :  { %v444_v38 = vmul.f32 0.03125, %v442_v37  ;;  %v440_v39 = vpop.xlane.xlu0 %439 }
 0x4ca   :  { %v443_v40 = vmul.f32 0.03125, %v440_v39 }
 0x4cb   :  { %v454_v42 = vmul.f32 %v444_v38, %v444_v38  ;;  %v464_v53 = vsub.f32 0.0, %v444_v38 }
 0x4cc   :  { %v450_v41 = vpop.xlane.xlu1 %449  ;;  %v453_v45 = vmul.f32 %v443_v40, %v443_v40  ;;  %v463_v55 = vsub.f32 0.0, %v443_v40 }
 0x4cd   :  { %v452_v43 = vmul.f32 0.03125, %v450_v41  ;;  %v448_v44 = vpop.xlane.xlu0 %447 }
 0x4ce   :  { %v451_v46 = vmul.f32 0.03125, %v448_v44 }
 0x4cf   :  { %v456_v47 = vsub.f32 %v452_v43, %v454_v42 }
 0x4d0   :  { %v455_v48 = vsub.f32 %v451_v46, %v453_v45 }
 0x4d1   :  { %v458_v49 = vmax.f32 %v456_v47, 0.0 }
 0x4d2   :  { %v457_v50 = vmax.f32 %v455_v48, 0.0 }
 0x4d3   :  { %v460_v51 = vadd.f32 1e-05, %v458_v49 }
 0x4d4   :  { %v459_v52 = vadd.f32 1e-05, %v457_v50 }
 0x4d5   :  { %1128 = vrsqrt.f32 %v460_v51 }
 0x4d6   :  { %1130 = vrsqrt.f32 %v459_v52 }
 0x4df   :  { %v1129_v54 = vpop.eup %1128 }
 0x4e0   :  { %v1131_v56 = vpop.eup %1130  ;;  %v466_v57 = vmul.f32 %v1129_v54, %v464_v53  ;;  %v468_v58 = vmul.f32 %v1129_v54, %v1405_v12  ;;  %v605_v12 = vld [vmem:[#allocation8 + $0x18] sm:$0xff] }
 0x4e1   :  { %v465_v59 = vmul.f32 %v1131_v56, %v463_v55  ;;  %v467_v60 = vmul.f32 %v1131_v56, %v1407_v13  ;;  %v1085_v13 = vpack.c.bf16 %v605_v12, %v604_v11 }
 0x4e2   :  { %v470_v62 = vadd.f32 %v468_v58, %v466_v57  ;;  %v727_v58 = vld [vmem:[%s1455_s5] ss:$0 sm:$0xff] }
 0x4e3   :  { %v469_v61 = vadd.f32 %v467_v60, %v465_v59  ;;  %1086 = vmatprep.subr.bf16.mxu0 %v1085_v13 }
 0x4e4   :  { %1088 = vmatpush3.bf16.msra.mxu0 %v1085_v13 }
 0x4e5   :  { %931 = vmatprep.mubr.f32.mxu1 %v469_v61  ;;  %1090 = vmatprep.subr.bf16.mxu0 %v1089_v16 }
 0x4e6   :  { %932 = vmatmul.mubr.f32.vlgmr.msra.gmra.mrb[2].mxu1 %v470_v62 }
 0x4e8   :  { %1092 = vmatpush3.bf16.msra.mxu0 %v1089_v16 }
 0x4e9   :  { %1094 = vmatprep.subr.bf16.mxu0 %v1093_v19 }
 0x4ec   :  { %1096 = vmatpush3.bf16.msra.mxu0 %v1093_v19 }
 0x4ed   :  { %1098 = vmatprep.subr.bf16.mxu0 %v1097_v22 }
 0x4f0   :  { %1100 = vmatpush3.bf16.msra.mxu0 %v1097_v22 }
 0x4f1   :  { %1102 = vmatprep.subr.bf16.mxu0 %v1101_v26 }
 0x4f4   :  { %1104 = vmatpush3.bf16.msra.mxu0 %v1101_v26 }
 0x4f5   :  { %1106 = vmatprep.subr.bf16.mxu0 %v1105_v28 }
 0x4f8   :  { %1108 = vmatpush3.bf16.msra.mxu0 %v1105_v28 }
 0x4f9   :  { %1110 = vmatprep.subr.bf16.mxu0 %v1109_v31 }
 0x4fc   :  { %1112 = vmatpush3.bf16.msra.mxu0 %v1109_v31 }
 0x5b9   :  { %v933_v3 = vpop.f32.mrb[2].mxu1 }
 0x5ba   :  { %v565_v4 = vadd.f32 %v933_v3, %v726_v2  ;;  %v559_v5 = vpop.f32.mrb[3].mxu1 }
 0x5bb   :  { %v560_v6 = vadd.f32 %v726_v2, %v559_v5 }
 0x5bc   :  { %v1420_v7 = vmax.f32 %v565_v4, 0.0 }
 0x5bd   :  { %v1422_v8 = vmax.f32 %v560_v6, 0.0 }
 0x5be   :  { %572 = vadd.xlane.f32.xlu1 %v1420_v7  ;;  %v577_v9 = vmul.f32 %v1420_v7, %v1420_v7 }
 0x5bf   :  { %570 = vadd.xlane.f32.xlu0 %v1422_v8  ;;  %v576_v10 = vmul.f32 %v1422_v8, %v1422_v8 }
 0x5c2   :  { %580 = vadd.xlane.f32.xlu1 %v577_v9 }
 0x5c3   :  { %578 = vadd.xlane.f32.xlu0 %v576_v10 }
 0x64b   :  { %v573_v32 = vpop.xlane.xlu1 %572 }
 0x64c   :  { %v575_v33 = vmul.f32 0.03125, %v573_v32  ;;  %v571_v34 = vpop.xlane.xlu0 %570 }
 0x64d   :  { %v574_v35 = vmul.f32 0.03125, %v571_v34 }
 0x64e   :  { %v585_v37 = vmul.f32 %v575_v33, %v575_v33  ;;  %v595_v48 = vsub.f32 0.0, %v575_v33 }
 0x64f   :  { %v581_v36 = vpop.xlane.xlu1 %580  ;;  %v584_v40 = vmul.f32 %v574_v35, %v574_v35  ;;  %v594_v50 = vsub.f32 0.0, %v574_v35 }
 0x650   :  { %v583_v38 = vmul.f32 0.03125, %v581_v36  ;;  %v579_v39 = vpop.xlane.xlu0 %578 }
 0x651   :  { %v582_v41 = vmul.f32 0.03125, %v579_v39 }
 0x652   :  { %v587_v42 = vsub.f32 %v583_v38, %v585_v37 }
 0x653   :  { %v586_v43 = vsub.f32 %v582_v41, %v584_v40 }
 0x654   :  { %v589_v44 = vmax.f32 %v587_v42, 0.0 }
 0x655   :  { %v588_v45 = vmax.f32 %v586_v43, 0.0 }
 0x656   :  { %v591_v46 = vadd.f32 1e-05, %v589_v44 }
 0x657   :  { %v590_v47 = vadd.f32 1e-05, %v588_v45 }
 0x658   :  { %1132 = vrsqrt.f32 %v591_v46 }
 0x659   :  { %1134 = vrsqrt.f32 %v590_v47 }
 0x662   :  { %v1133_v49 = vpop.eup %1132 }
 0x663   :  { %v1135_v51 = vpop.eup %1134  ;;  %v597_v52 = vmul.f32 %v1133_v49, %v595_v48  ;;  %v599_v53 = vmul.f32 %v1133_v49, %v1420_v7 }
 0x664   :  { %v596_v54 = vmul.f32 %v1135_v51, %v594_v50  ;;  %v598_v55 = vmul.f32 %v1135_v51, %v1422_v8 }
 0x665   :  { %v601_v57 = vadd.f32 %v599_v53, %v597_v52 }
 0x666   :  { %v600_v56 = vadd.f32 %v598_v55, %v596_v54 }
 0x668   :  { %966 = vmatprep.mubr.f32.mxu0 %v600_v56 }
 0x669   :  { %967 = vmatmul.mubr.f32.vlgmr.msra.gmra.mrb[4].mxu0 %v601_v57 }
 0x73c   :  { %v968_v59 = vpop.f32.mrb[4].mxu0 }
 0x73d   :  { %v697_v60 = vadd.f32 %v968_v59, %v727_v58  ;;  %v691_v61 = vpop.f32.mrb[5].mxu0 }
 0x73e   :  { %v692_v62 = vadd.f32 %v727_v58, %v691_v61 }
 0x73f   :  { %701 = vst [vmem:[#allocation10 + $0x8] sm:$0xff] %v697_v60 }
 0x740   :  { %700 = vst [vmem:[#allocation10] sm:$0xff] %v692_v62 }
 0x741   :  { %1235 = shalt.err (!%p1232_p8)
}
 0x742   :  { %s1236_s5 = scalar_lea.hbm %s1456_s6, 256 }
 0x743   :  { %p1237_p9 = scmp.ne.s32.totalorder %s1456_s6, %s1236_s5  ;;  %p1240_p10 = scmp.lt.u32.totalorder %s1236_s5, %s1456_s6 }
 0x745   :  { %p1242_p11 = pnand %p1240_p10, %p1237_p9 }
 0x747   :  { %1245 = shalt.err (!%p1242_p11)
}
 0x748   :  { %713 = dma.vmem_to_hbm [thread:$0]  %s708_s7, 256, %s1456_s6, [#allocation4], %s1256_s9, %s1256_s9, %s1257_s10  }
 0x749   :  { %1252 = dma.done.wait [#allocation4], 256  }
 0x74a   :  { %1253 = vsyncadd [#allocation4], 4294967040 }
 0x74b   :  { %717 = vsyncpa [#allocation3], 1 }
 0x74c   :  { %718 = vsyncpa [#allocation6], 1 }
 0x74d   :  { %719 = vsyncpa [#allocation9], 1 }
 0x74e   :  { %720 = vsyncpa [#allocation4], 1 }

</bundles_post_ra>
